<compile_context>
chip_gen: v7x
topology: tpu7x:2x2x1
jax: 0.10.0
libtpu: 0.0.40
codegen_flags: <defaults>
</compile_context>

<pallas_src>
import functools

import jax
import jax.numpy as jnp
from jax.experimental import pallas as pl
from jax.experimental.pallas import tpu as pltpu

IN_FEATURES = 256
HID1 = 256
HID2 = 128
LEAKY_SLOPE = 0.1


def _leaky_relu(x):
    # max(x, a*x) == leaky_relu(x, a) for 0 < a < 1; one VALU op vs cmp+select.
    return jnp.maximum(x, LEAKY_SLOPE * x)


def next_obj_predict_kernel(x_ref, w1_ref, b1_ref, w2_ref, b2_ref,
                            w3_ref, b3_ref, o_ref):
    """One batch tile of the 3-layer MLP.

    x_ref:  (TB, 256) in the caller's dtype (cast to bf16 in-kernel)
    wN_ref: bf16 weights in (in, out) layout, resident across grid steps
    bN_ref: biases in the epilogue dtype (f32 on v5e, bf16 on v6e/v7x)
    o_ref:  (TB, OUT_PAD) bf16, lane-dense (128-multiple) output
    """
    epi = b1_ref.dtype
    x = x_ref[...].astype(jnp.bfloat16)                     # in-kernel cast
    h1 = jnp.dot(x, w1_ref[...], preferred_element_type=jnp.float32)
    h1 = _leaky_relu(h1.astype(epi) + b1_ref[...])          # (TB, 256)
    h2 = jnp.dot(h1.astype(jnp.bfloat16), w2_ref[...],
                 preferred_element_type=jnp.float32)
    h2 = _leaky_relu(h2.astype(epi) + b2_ref[...])          # (TB, 128)
    h3 = jnp.dot(h2.astype(jnp.bfloat16), w3_ref[...],
                 preferred_element_type=jnp.float32)
    o_ref[...] = (h3.astype(epi) + b3_ref[...]).astype(o_ref.dtype)


def _round_up(n, m):
    return ((n + m - 1) // m) * m


def _device_kind():
    try:
        return jax.devices()[0].device_kind.lower()
    except Exception:
        return ""


@functools.partial(jax.jit, static_argnames=("tb",))
def next_obj_predict(x, params, *, tb=4096):
    """Forward pass of NextObjPredict as one Pallas kernel.

    x: (B, ...) whose trailing dims flatten to 256 features.
    params: (w1, b1, w2, b2, w3, b3); weights stored (in, out).
    Returns (B, output_size) float32.
    """
    B = x.shape[0]
    x2 = x.reshape(B, -1)                          # Flatten (layout-only)
    assert x2.shape[1] == IN_FEATURES, "NextObjPredict expects 256 features"
    w1, b1, w2, b2, w3, b3 = params
    out_size = w3.shape[1]
    out_pad = max(128, _round_up(out_size, 128))   # lane-dense output width

    kind = _device_kind()
    # bf16 epilogue only where the VPU is bf16-native (v6e/v7x); f32 elsewhere.
    epi = jnp.bfloat16 if ("v6" in kind or "v7" in kind) else jnp.float32
    # v7x has 2 TensorCores/chip: make the "parallel" batch axis splittable.
    n_cores = 2 if "v7" in kind else 1

    # ---- batch-tile selection (static Python) -----------------------------
    tb = max(8, (tb // 8) * 8)                               # sublane aligned
    tb = min(tb, _round_up(B, 8))                            # tiny-batch clamp
    tb = min(tb, max(8, _round_up(pl.cdiv(B, n_cores), 8)))  # >=1 block / core
    nb = pl.cdiv(B, tb)          # final partial block is masked by Pallas

    # Weights cast once to bf16 (MXU operands); biases in the epilogue dtype.
    w1b = w1.astype(jnp.bfloat16)
    w2b = w2.astype(jnp.bfloat16)
    w3b = jnp.zeros((HID2, out_pad), jnp.bfloat16).at[:, :out_size].set(
        w3.astype(jnp.bfloat16))
    b1e = b1.reshape(1, HID1).astype(epi)
    b2e = b2.reshape(1, HID2).astype(epi)
    b3e = jnp.zeros((1, out_pad), epi).at[:, :out_size].set(
        b3.reshape(1, out_size).astype(epi))

    # Constant index maps keep weights/biases resident in VMEM across steps.
    # NOTE: pl.Buffered(1) single-buffering of these resident operands would
    # save ~0.5 MiB VMEM; omitted for portability since the saving is tiny.
    resident = lambda a: pl.BlockSpec(a.shape, lambda i: (0,) * a.ndim)

    flops = 2 * B * (IN_FEATURES * HID1 + HID1 * HID2 + HID2 * out_pad)
    bytes_accessed = (
        B * IN_FEATURES * x2.dtype.itemsize                        # x read
        + (IN_FEATURES * HID1 + HID1 * HID2 + HID2 * out_pad) * 2  # weights
        + (HID1 + HID2 + out_pad) * jnp.dtype(epi).itemsize        # biases
        + B * out_pad * 2                                          # bf16 out
    )

    out = pl.pallas_call(
        next_obj_predict_kernel,
        out_shape=jax.ShapeDtypeStruct((B, out_pad), jnp.bfloat16),
        grid=(nb,),
        in_specs=[
            pl.BlockSpec((tb, IN_FEATURES), lambda i: (i, 0)),   # x tile
            resident(w1b), resident(b1e), resident(w2b), resident(b2e),
            resident(w3b), resident(b3e),
        ],
        out_specs=pl.BlockSpec((tb, out_pad), lambda i: (i, 0)),
        compiler_params=pltpu.CompilerParams(
            dimension_semantics=("parallel",),
            # Room for double-buffered x/out blocks + f32/bf16 temporaries at
            # tb up to 4096 (v5e scoped default is only 16 MiB; still safely
            # under v7x's 64 MiB physical VMEM per TC).
            vmem_limit_bytes=48 * 1024 * 1024,
        ),
        cost_estimate=pl.CostEstimate(flops=flops, transcendentals=0,
                                      bytes_accessed=bytes_accessed),
    )(x2, w1b, b1e, w2b, b2e, w3b, b3e)

    # Drop the zero-padded columns; upcast only the tiny (B, out) slice.
    return out[:, :out_size].astype(jnp.float32)


def init_params(key, output_size=8):
    """Deterministic init matching PyTorch Linear shapes.
    PyTorch stores weight as (out, in); we keep (in, out) for x @ W."""
    dims = [(IN_FEATURES, HID1), (HID1, HID2), (HID2, output_size)]
    params = []
    for i, (fin, fout) in enumerate(dims):
        kw, kb = jax.random.split(jax.random.fold_in(key, i))
        bound = 1.0 / jnp.sqrt(fin)
        w = jax.random.uniform(kw, (fin, fout), jnp.float32, -bound, bound)
        b = jax.random.uniform(kb, (1, fout), jnp.float32, -bound, bound)
        params += [w, b]
    return tuple(params)


def next_obj_predict_ref(x, params):
    B = x.shape[0]
    h = x.reshape(B, -1).astype(jnp.float32)
    w1, b1, w2, b2, w3, b3 = params
    h = jax.nn.leaky_relu(h @ w1 + b1, 0.1)
    h = jax.nn.leaky_relu(h @ w2 + b2, 0.1)
    return h @ w3 + b3


if __name__ == "__main__":
    key = jax.random.PRNGKey(0)
    kx, kp = jax.random.split(key)
    # (B=2, C=4, H=8, W=8) flattens to 256 features, matching nn.Linear(256,.)
    x = jax.random.normal(kx, (2, 4, 8, 8), jnp.float32)
    output_size = 8
    params = init_params(kp, output_size)

    out = next_obj_predict(x, params)
    out = jax.block_until_ready(out)

    ref = next_obj_predict_ref(x, params)
    assert out.shape == (2, output_size)
    # bf16 MXU operands + bf16 output (and bf16 epilogue on v6e/v7x).
    max_err = float(jnp.max(jnp.abs(out - ref)))
    assert jnp.allclose(out, ref, atol=3e-2, rtol=3e-2), f"mismatch: {max_err}"
    print("KERNEL_OK")
</pallas_src>

<mosaic_0001>
module attributes {stable_mosaic.version = 11 : i64} {
  func.func @next_obj_predict_kernel(%arg0: i32, %arg1: memref<8x256xf32, #tpu.memory_space<vmem>>, %arg2: memref<256x256xbf16, #tpu.memory_space<vmem>>, %arg3: memref<1x256xf32, #tpu.memory_space<vmem>>, %arg4: memref<256x128xbf16, #tpu.memory_space<vmem>>, %arg5: memref<1x128xf32, #tpu.memory_space<vmem>>, %arg6: memref<128x128xbf16, #tpu.memory_space<vmem>>, %arg7: memref<1x128xf32, #tpu.memory_space<vmem>>, %arg8: memref<8x128xbf16, #tpu.memory_space<vmem>>) attributes {dimension_semantics = [#tpu.dimension_semantics<parallel>], iteration_bounds = array<i64: 1>, scalar_prefetch = 0 : i64, scratch_operands = 0 : i64, tpu.core_type = #tpu.core_type<tc>, window_params = [{transform_indices = @transform_0, window_bounds = array<i64: 8, 256>}, {pipeline_mode = #tpu.pipeline_mode<synchronous>, transform_indices = @transform_1, window_bounds = array<i64: 256, 256>}, {pipeline_mode = #tpu.pipeline_mode<synchronous>, transform_indices = @transform_2, window_bounds = array<i64: 1, 256>}, {pipeline_mode = #tpu.pipeline_mode<synchronous>, transform_indices = @transform_3, window_bounds = array<i64: 256, 128>}, {pipeline_mode = #tpu.pipeline_mode<synchronous>, transform_indices = @transform_4, window_bounds = array<i64: 1, 128>}, {pipeline_mode = #tpu.pipeline_mode<synchronous>, transform_indices = @transform_5, window_bounds = array<i64: 128, 128>}, {pipeline_mode = #tpu.pipeline_mode<synchronous>, transform_indices = @transform_6, window_bounds = array<i64: 1, 128>}, {transform_indices = @transform_7, window_bounds = array<i64: 8, 128>}]} {
    %c0 = arith.constant 0 : index
    %c0_0 = arith.constant 0 : index
    %0 = vector.load %arg1[%c0, %c0_0] : memref<8x256xf32, #tpu.memory_space<vmem>>, vector<8x256xf32>
    %1 = arith.truncf %0 : vector<8x256xf32> to vector<8x256xbf16>
    %c0_1 = arith.constant 0 : index
    %c0_2 = arith.constant 0 : index
    %2 = vector.load %arg2[%c0_1, %c0_2] : memref<256x256xbf16, #tpu.memory_space<vmem>>, vector<256x256xbf16>
    %cst = arith.constant dense<0.000000e+00> : vector<8x256xf32>
    %3 = tpu.matmul %1, %2, %cst {dimension_numbers = #tpu.dot_dimension_numbers<[1], [0], [0], [1], [0, 0, 1, 1], [], []>} : vector<8x256xbf16>, vector<256x256xbf16>, vector<8x256xf32> -> vector<8x256xf32>
    %c0_3 = arith.constant 0 : index
    %c0_4 = arith.constant 0 : index
    %4 = vector.load %arg3[%c0_3, %c0_4] : memref<1x256xf32, #tpu.memory_space<vmem>>, vector<1x256xf32>
    %5 = vector.broadcast %4 : vector<1x256xf32> to vector<8x256xf32>
    %6 = arith.addf %3, %5 : vector<8x256xf32>
    %cst_5 = arith.constant 1.000000e-01 : f32
    %7 = vector.broadcast %cst_5 : f32 to vector<8x256xf32>
    %8 = arith.mulf %7, %6 : vector<8x256xf32>
    %9 = arith.maximumf %6, %8 : vector<8x256xf32>
    %10 = arith.truncf %9 : vector<8x256xf32> to vector<8x256xbf16>
    %c0_6 = arith.constant 0 : index
    %c0_7 = arith.constant 0 : index
    %11 = vector.load %arg4[%c0_6, %c0_7] : memref<256x128xbf16, #tpu.memory_space<vmem>>, vector<256x128xbf16>
    %cst_8 = arith.constant dense<0.000000e+00> : vector<8x128xf32>
    %12 = tpu.matmul %10, %11, %cst_8 {dimension_numbers = #tpu.dot_dimension_numbers<[1], [0], [0], [1], [0, 0, 1, 1], [], []>} : vector<8x256xbf16>, vector<256x128xbf16>, vector<8x128xf32> -> vector<8x128xf32>
    %c0_9 = arith.constant 0 : index
    %c0_10 = arith.constant 0 : index
    %13 = vector.load %arg5[%c0_9, %c0_10] : memref<1x128xf32, #tpu.memory_space<vmem>>, vector<1x128xf32>
    %14 = vector.broadcast %13 : vector<1x128xf32> to vector<8x128xf32>
    %15 = arith.addf %12, %14 : vector<8x128xf32>
    %cst_11 = arith.constant 1.000000e-01 : f32
    %16 = vector.broadcast %cst_11 : f32 to vector<8x128xf32>
    %17 = arith.mulf %16, %15 : vector<8x128xf32>
    %18 = arith.maximumf %15, %17 : vector<8x128xf32>
    %19 = arith.truncf %18 : vector<8x128xf32> to vector<8x128xbf16>
    %c0_12 = arith.constant 0 : index
    %c0_13 = arith.constant 0 : index
    %20 = vector.load %arg6[%c0_12, %c0_13] : memref<128x128xbf16, #tpu.memory_space<vmem>>, vector<128x128xbf16>
    %cst_14 = arith.constant dense<0.000000e+00> : vector<8x128xf32>
    %21 = tpu.matmul %19, %20, %cst_14 {dimension_numbers = #tpu.dot_dimension_numbers<[1], [0], [0], [1], [0, 0, 1, 1], [], []>} : vector<8x128xbf16>, vector<128x128xbf16>, vector<8x128xf32> -> vector<8x128xf32>
    %c0_15 = arith.constant 0 : index
    %c0_16 = arith.constant 0 : index
    %22 = vector.load %arg7[%c0_15, %c0_16] : memref<1x128xf32, #tpu.memory_space<vmem>>, vector<1x128xf32>
    %23 = vector.broadcast %22 : vector<1x128xf32> to vector<8x128xf32>
    %24 = arith.addf %21, %23 : vector<8x128xf32>
    %25 = arith.truncf %24 : vector<8x128xf32> to vector<8x128xbf16>
    %c0_17 = arith.constant 0 : index
    %c0_18 = arith.constant 0 : index
    %26 = vector.load %arg8[%c0_17, %c0_18] : memref<8x128xbf16, #tpu.memory_space<vmem>>, vector<8x128xbf16>
    tpu.vector_store %arg8[%c0_17, %c0_18], %25 {strides = array<i32>} : memref<8x128xbf16, #tpu.memory_space<vmem>>, vector<8x128xbf16>,
    return
  }
  func.func @transform_0(%arg0: i32) -> (i32, i32) {
    %c0_i32 = arith.constant 0 : i32
    %c0_i32_0 = arith.constant 0 : i32
    return %arg0, %c0_i32 : i32, i32
  }
  func.func @transform_1(%arg0: i32) -> (i32, i32) {
    %c0_i32 = arith.constant 0 : i32
    %c0_i32_0 = arith.constant 0 : i32
    %c0_i32_1 = arith.constant 0 : i32
    return %c0_i32, %c0_i32_0 : i32, i32
  }
  func.func @transform_2(%arg0: i32) -> (i32, i32) {
    %c0_i32 = arith.constant 0 : i32
    %c0_i32_0 = arith.constant 0 : i32
    %c0_i32_1 = arith.constant 0 : i32
    return %c0_i32, %c0_i32_0 : i32, i32
  }
  func.func @transform_3(%arg0: i32) -> (i32, i32) {
    %c0_i32 = arith.constant 0 : i32
    %c0_i32_0 = arith.constant 0 : i32
    %c0_i32_1 = arith.constant 0 : i32
    return %c0_i32, %c0_i32_0 : i32, i32
  }
  func.func @transform_4(%arg0: i32) -> (i32, i32) {
    %c0_i32 = arith.constant 0 : i32
    %c0_i32_0 = arith.constant 0 : i32
    %c0_i32_1 = arith.constant 0 : i32
    return %c0_i32, %c0_i32_0 : i32, i32
  }
  func.func @transform_5(%arg0: i32) -> (i32, i32) {
    %c0_i32 = arith.constant 0 : i32
    %c0_i32_0 = arith.constant 0 : i32
    %c0_i32_1 = arith.constant 0 : i32
    return %c0_i32, %c0_i32_0 : i32, i32
  }
  func.func @transform_6(%arg0: i32) -> (i32, i32) {
    %c0_i32 = arith.constant 0 : i32
    %c0_i32_0 = arith.constant 0 : i32
    %c0_i32_1 = arith.constant 0 : i32
    return %c0_i32, %c0_i32_0 : i32, i32
  }
  func.func @transform_7(%arg0: i32) -> (i32, i32) {
    %c0_i32 = arith.constant 0 : i32
    %c0_i32_0 = arith.constant 0 : i32
    return %arg0, %c0_i32 : i32, i32
  }
}

</mosaic_0001>

<bundles_post_ra>
// kernel: next_obj_predict.1
= control target key start
LH: loop header
LB: loop body
LE: loop exit
PB: predicated region body
PF: predicated region fallthrough
CT: control target
= control target key end

     0   :  { %v40_v9 = vlaneseq  ;;  %v861_v56 = vmov 0.0   ;;  %vm862_vm0 = vmmov 0   ;;  %s1095_s0 = inlined_call_operand.vmem [shape: f32[2,256], index: 0, kind: input, shape index: {}]   ;;  %s1096_s1 = inlined_call_operand.vmem [shape: bf16[256,256], index: 1, kind: input, shape index: {}]   ;;  %s1097_s2 = inlined_call_operand.vmem [shape: f32[1,256], index: 2, kind: input, shape index: {}]   ;;  %s1098_s3 = inlined_call_operand.vmem [shape: bf16[256,128], index: 3, kind: input, shape index: {}]   ;;  %s1099_s4 = inlined_call_operand.vmem [shape: f32[1,128], index: 4, kind: input, shape index: {}]   ;;  %s1100_s5 = inlined_call_operand.vmem [shape: bf16[128,128], index: 5, kind: input, shape index: {}]   ;;  %s1101_s6 = inlined_call_operand.vmem [shape: f32[1,128], index: 6, kind: input, shape index: {}]   ;;  %s1102_s7 = inlined_call_operand.vmem [shape: bf16[2,128], index: 7, kind: output, shape index: {}]  }
   0x1   :  { %v785_v0 = vld [vmem:[%s1096_s1 + $0x4] ss:$8 sps:$4 sm:$0xff]   ;;  %v787_v1 = vld [vmem:[%s1096_s1] ss:$8 sps:$4 sm:$0xff]   ;;  %v788_v2 = vld [vmem:[%s1096_s1 + $0x14] ss:$8 sps:$4 sm:$0xff]  }
   0x2   :  { %261 = vmatprep.subr.bf16.mxu0 %v785_v0  ;;  %v790_v3 = vld [vmem:[%s1096_s1 + $0x10] ss:$8 sps:$4 sm:$0xff]   ;;  %v791_v4 = vld [vmem:[%s1096_s1 + $0x24] ss:$8 sps:$4 sm:$0xff]   ;;  %v793_v5 = vld [vmem:[%s1096_s1 + $0x20] ss:$8 sps:$4 sm:$0xff]  }
   0x3   :  { %262 = vmatpush1.bf16.msra.mxu0 %v787_v1  ;;  %v794_v6 = vld [vmem:[%s1096_s1 + $0x34] ss:$8 sps:$4 sm:$0xff]   ;;  %v796_v7 = vld [vmem:[%s1096_s1 + $0x30] ss:$8 sps:$4 sm:$0xff]   ;;  %v797_v8 = vld [vmem:[%s1096_s1 + $0x44] ss:$8 sps:$4 sm:$0xff]  }
   0x4   :  { %263 = vmatprep.subr.bf16.mxu0 %v788_v2  ;;  %v799_v10 = vld [vmem:[%s1096_s1 + $0x40] ss:$8 sps:$4 sm:$0xff]   ;;  %v800_v11 = vld [vmem:[%s1096_s1 + $0x54] ss:$8 sps:$4 sm:$0xff]   ;;  %v937_v12 = vshrl.u32 %v40_v9, 7 }
   0x5   :  { %v802_v13 = vld [vmem:[%s1096_s1 + $0x50] ss:$8 sps:$4 sm:$0xff]   ;;  %v803_v14 = vld [vmem:[%s1096_s1 + $0x64] ss:$8 sps:$4 sm:$0xff]   ;;  %v805_v15 = vld [vmem:[%s1096_s1 + $0x60] ss:$8 sps:$4 sm:$0xff]  }
   0x6   :  { %v806_v16 = vld [vmem:[%s1096_s1 + $0x74] ss:$8 sps:$4 sm:$0xff]   ;;  %v859_v17 = vld.sshfl [vmem:[%s1095_s0] sm:$0xff pattern:$0x76325410]  ;;  %v837_v22 = vld [vmem:[%s1098_s3 + $0x48] sm:$0xff]  }
   0x7   :  { %264 = vmatpush1.bf16.msra.mxu0 %v790_v3  ;;  %v860_v18 = vld.sshfl [vmem:[%s1095_s0 + $0x8] sm:$0xff pattern:$0x76325410]  ;;  %v835_v19 = vld [vmem:[%s1098_s3 + $0x40] sm:$0xff]   ;;  %v808_v20 = vld [vmem:[%s1096_s1 + $0x70] ss:$8 sps:$4 sm:$0xff]  }
   0x8   :  { %265 = vmatprep.subr.bf16.mxu0 %v791_v4  ;;  %v836_v21 = vld [vmem:[%s1098_s3] sm:$0xff]   ;;  %730 = vmatprep.subr.bf16.mxu1 %v835_v19  ;;  %v52_v24 = vcombine.high %v859_v17, %v860_v18  ;;  %v838_v25 = vld [vmem:[%s1098_s3 + $0x8] sm:$0xff]   ;;  %v839_v27 = vld [vmem:[%s1098_s3 + $0x50] sm:$0xff]   ;;  %v51_v48 = vcombine.low %v859_v17, %v860_v18  ;;  %v93_v57 = vsub.s32 0, %v937_v12  ;;  %v97_v59 = vsub.s32 1, %v937_v12 }
   0x9   :  { %v809_v23 = vld [vmem:[%s1096_s1 + $0x84] ss:$8 sps:$4 sm:$0xff]   ;;  %731 = vmatpush3.bf16.msra.mxu1 %v836_v21  ;;  %v811_v28 = vld [vmem:[%s1096_s1 + $0x80] ss:$8 sps:$4 sm:$0xff]   ;;  %v812_v29 = vld [vmem:[%s1096_s1 + $0x94] ss:$8 sps:$4 sm:$0xff]  }
   0xa   :  { %732 = vmatprep.subr.bf16.mxu1 %v837_v22  ;;  %v56_v26 = vpack.c.bf16 %v52_v24, %v52_v24  ;;  %v840_v30 = vld [vmem:[%s1098_s3 + $0x10] sm:$0xff]   ;;  %v841_v32 = vld [vmem:[%s1098_s3 + $0x58] sm:$0xff]   ;;  %v815_v33 = vld [vmem:[%s1096_s1 + $0xa4] ss:$8 sps:$4 sm:$0xff]   ;;  %v55_v50 = vpack.c.bf16 %v51_v48, %v51_v48 }
   0xb   :  { %266 = vmatpush1.bf16.msra.mxu0 %v793_v5  ;;  %v814_v31 = vld [vmem:[%s1096_s1 + $0x90] ss:$8 sps:$4 sm:$0xff]   ;;  %v843_v35 = vld [vmem:[%s1098_s3 + $0x60] sm:$0xff]   ;;  %v818_v37 = vld [vmem:[%s1096_s1 + $0xb4] ss:$8 sps:$4 sm:$0xff]  }
   0xc   :  { %267 = vmatprep.subr.bf16.mxu0 %v794_v6  ;;  %293 = vmatprep.mubr.bf16.mxu0 %v56_v26  ;;  %v842_v34 = vld [vmem:[%s1098_s3 + $0x18] sm:$0xff]   ;;  %v817_v36 = vld [vmem:[%s1096_s1 + $0xa0] ss:$8 sps:$4 sm:$0xff]   ;;  %v821_v41 = vld [vmem:[%s1096_s1 + $0xc4] ss:$8 sps:$4 sm:$0xff]  }
   0xd   :  { %733 = vmatpush3.bf16.msra.mxu1 %v838_v25  ;;  %v844_v38 = vld [vmem:[%s1098_s3 + $0x20] sm:$0xff]   ;;  %v845_v39 = vld [vmem:[%s1098_s3 + $0x68] sm:$0xff]   ;;  %v820_v40 = vld [vmem:[%s1096_s1 + $0xb0] ss:$8 sps:$4 sm:$0xff]  }
   0xe   :  { %734 = vmatprep.subr.bf16.mxu1 %v839_v27  ;;  %v823_v42 = vld [vmem:[%s1096_s1 + $0xc0] ss:$8 sps:$4 sm:$0xff]   ;;  %v824_v43 = vld [vmem:[%s1096_s1 + $0xd4] ss:$8 sps:$4 sm:$0xff]   ;;  %v826_v44 = vld [vmem:[%s1096_s1 + $0xd0] ss:$8 sps:$4 sm:$0xff]  }
   0xf   :  { %268 = vmatpush1.bf16.msra.mxu0 %v796_v7  ;;  %v827_v45 = vld [vmem:[%s1096_s1 + $0xe4] ss:$8 sps:$4 sm:$0xff]   ;;  %v829_v46 = vld [vmem:[%s1096_s1 + $0xe0] ss:$8 sps:$4 sm:$0xff]   ;;  %v830_v47 = vld [vmem:[%s1096_s1 + $0xf4] ss:$8 sps:$4 sm:$0xff]  }
  0x10   :  { %269 = vmatprep.subr.bf16.mxu0 %v797_v8  ;;  %v832_v49 = vld [vmem:[%s1096_s1 + $0xf0] ss:$8 sps:$4 sm:$0xff]   ;;  %v846_v51 = vld [vmem:[%s1098_s3 + $0x28] sm:$0xff]   ;;  %v89_v58 = vld [vmem:[%s1097_s2] sm:$0x3] }
  0x11   :  { %735 = vmatpush3.bf16.msra.mxu1 %v840_v30  ;;  %v847_v52 = vld [vmem:[%s1098_s3 + $0x70] sm:$0xff]   ;;  %v849_v54 = vld [vmem:[%s1098_s3 + $0x78] sm:$0xff]   ;;  %v94_v60 = vrot.slane %v89_v58, %v93_v57  ;;  %v98_v61 = vrot.slane %v89_v58, %v97_v59  ;;  %v851_v9 = vld [vmem:[%s1100_s5] sm:$0xff]  }
  0x12   :  { %736 = vmatprep.subr.bf16.mxu1 %v841_v32  ;;  %v848_v53 = vld [vmem:[%s1098_s3 + $0x30] sm:$0xff]   ;;  %v850_v55 = vld [vmem:[%s1098_s3 + $0x38] sm:$0xff]   ;;  %v719_v32 = vld [vmem:[%s1101_s6] ss:$0 sm:$0xff] }
  0x13   :  { %270 = vmatpush1.bf16.msra.mxu0 %v799_v10  ;;  %v857_v17 = vld [vmem:[%s1100_s5 + $0x30] sm:$0xff]   ;;  %v858_v18 = vld [vmem:[%s1100_s5 + $0x38] sm:$0xff]  }
  0x14   :  { %271 = vmatprep.subr.bf16.mxu0 %v800_v11  ;;  %v852_v11 = vld [vmem:[%s1100_s5 + $0x8] sm:$0xff]  }
  0x15   :  { %737 = vmatpush3.bf16.msra.mxu1 %v842_v34 }
  0x16   :  { %738 = vmatprep.subr.bf16.mxu1 %v843_v35 }
  0x17   :  { %272 = vmatpush1.bf16.msra.mxu0 %v802_v13  ;;  %v853_v13 = vld [vmem:[%s1100_s5 + $0x10] sm:$0xff]  }
  0x18   :  { %273 = vmatprep.subr.bf16.mxu0 %v803_v14  ;;  %v854_v14 = vld [vmem:[%s1100_s5 + $0x18] sm:$0xff]  }
  0x19   :  { %739 = vmatpush3.bf16.msra.mxu1 %v844_v38 }
  0x1a   :  { %740 = vmatprep.subr.bf16.mxu1 %v845_v39 }
  0x1b   :  { %274 = vmatpush1.bf16.msra.mxu0 %v805_v15  ;;  %v855_v15 = vld [vmem:[%s1100_s5 + $0x20] sm:$0xff]  }
  0x1c   :  { %275 = vmatprep.subr.bf16.mxu0 %v806_v16  ;;  %v856_v16 = vld [vmem:[%s1100_s5 + $0x28] sm:$0xff]  }
  0x1d   :  { %741 = vmatpush3.bf16.msra.mxu1 %v846_v51 }
  0x1e   :  { %742 = vmatprep.subr.bf16.mxu1 %v847_v52 }
  0x1f   :  { %276 = vmatpush1.bf16.msra.mxu0 %v808_v20  ;;  %v702_v20 = vld [vmem:[%s1099_s4] ss:$0 sm:$0xff] }
  0x20   :  { %277 = vmatprep.subr.bf16.mxu0 %v809_v23 }
  0x21   :  { %743 = vmatpush3.bf16.msra.mxu1 %v848_v53 }
  0x22   :  { %744 = vmatprep.subr.bf16.mxu1 %v849_v54 }
  0x23   :  { %278 = vmatpush1.bf16.msra.mxu0 %v811_v28 }
  0x24   :  { %279 = vmatprep.subr.bf16.mxu0 %v812_v29  ;;  %v863_v29 = vmov 1966171168  }
  0x25   :  { %745 = vmatpush3.bf16.msra.mxu1 %v850_v55  ;;  %v600_v30 = vunpack.c.l.s4 %v863_v29 }
  0x26   :  { %761 = vmatprep.subr.bf16.mxu1 %v861_v56 }
  0x27   :  { %280 = vmatpush1.bf16.msra.mxu0 %v814_v31  ;;  %v601_v31 = vunpack.c.0.s8 %v600_v30 }
  0x28   :  { %281 = vmatprep.subr.bf16.mxu0 %v815_v33 }
  0x29   :  { %v604_v35 = vsub.s32 %v601_v31, %v937_v12 }
  0x2b   :  { %282 = vmatpush1.bf16.msra.mxu0 %v817_v36 }
  0x2c   :  { %283 = vmatprep.subr.bf16.mxu0 %v818_v37 }
  0x2f   :  { %284 = vmatpush1.bf16.msra.mxu0 %v820_v40 }
  0x30   :  { %285 = vmatprep.subr.bf16.mxu0 %v821_v41 }
  0x33   :  { %286 = vmatpush1.bf16.msra.mxu0 %v823_v42 }
  0x34   :  { %287 = vmatprep.subr.bf16.mxu0 %v824_v43 }
  0x37   :  { %288 = vmatpush1.bf16.msra.mxu0 %v826_v44 }
  0x38   :  { %289 = vmatprep.subr.bf16.mxu0 %v827_v45 }
  0x3b   :  { %290 = vmatpush1.bf16.msra.mxu0 %v829_v46 }
  0x3c   :  { %291 = vmatprep.subr.bf16.mxu0 %v830_v47 }
  0x3f   :  { %292 = vmatpush1.bf16.msra.mxu0 %v832_v49 }
  0x42   :  { %294 = vmatmul.mubr.bf16.vlgmr.msra.gmra.mrb[0].mxu0 %v55_v50 }
 0x115   :  { %v295_v62 = vpop.f32.mrb[0].mxu0 }
 0x116   :  { %v296_v63 = vadd.f32 %v295_v62, %v94_v60  ;;  %v297_v0 = vpop.f32.mrb[1].mxu0 }
 0x117   :  { %v298_v1 = vadd.f32 %v297_v0, %v98_v61  ;;  %v299_v2 = vpop.f32.mrb[2].mxu0 }
 0x118   :  { %v302_v3 = vmul.f32 0.1, %v296_v63  ;;  %v300_v4 = vpop.f32.mrb[3].mxu0 }
 0x119   :  { %v303_v5 = vmul.f32 0.1, %v298_v1 }
 0x11a   :  { %v304_v6 = vmax.f32 %v296_v63, %v302_v3 }
 0x11b   :  { %v305_v7 = vmax.f32 %v298_v1, %v303_v5 }
 0x11c   :  { %v306_v10 = vpack.c.bf16 %v304_v6, %v304_v6 }
 0x11d   :  { %v307_v8 = vpack.c.bf16 %v305_v7, %v305_v7 }
 0x11f   :  { %475 = vmatprep.mubr.bf16.mxu1 %v307_v8 }
 0x120   :  { %476 = vmatmul.mubr.bf16.vlgmr.msra.gmra.mrb[0].mxu1 %v306_v10 }
 0x121   :  { %762 = vmatpush3.bf16.msra.mxu1 %v851_v9  ;;  %777 = vmatprep.mubr.msk.bf16.mxu1 %vm862_vm0, %v861_v56 }
 0x122   :  { %763 = vmatprep.subr.bf16.mxu1 %v861_v56 }
 0x125   :  { %764 = vmatpush3.bf16.msra.mxu1 %v852_v11 }
 0x126   :  { %765 = vmatprep.subr.bf16.mxu1 %v861_v56 }
 0x129   :  { %766 = vmatpush3.bf16.msra.mxu1 %v853_v13 }
 0x12a   :  { %767 = vmatprep.subr.bf16.mxu1 %v861_v56 }
 0x12d   :  { %768 = vmatpush3.bf16.msra.mxu1 %v854_v14 }
 0x12e   :  { %769 = vmatprep.subr.bf16.mxu1 %v861_v56 }
 0x131   :  { %770 = vmatpush3.bf16.msra.mxu1 %v855_v15 }
 0x132   :  { %771 = vmatprep.subr.bf16.mxu1 %v861_v56 }
 0x135   :  { %772 = vmatpush3.bf16.msra.mxu1 %v856_v16 }
 0x136   :  { %773 = vmatprep.subr.bf16.mxu1 %v861_v56 }
 0x139   :  { %774 = vmatpush3.bf16.msra.mxu1 %v857_v17 }
 0x13a   :  { %775 = vmatprep.subr.bf16.mxu1 %v861_v56 }
 0x13d   :  { %776 = vmatpush3.bf16.msra.mxu1 %v858_v18 }
 0x1f3   :  { %v746_v19 = vpop.f32.mrb[0].mxu1 }
 0x1f4   :  { %v747_v21 = vpop.f32.mrb[1].mxu1 }
 0x1f5   :  { %v748_v22 = vadd.f32 %v747_v21, %v746_v19  ;;  %v749_v23 = vpop.f32.mrb[2].mxu1 }
 0x1f6   :  { %v750_v24 = vpop.f32.mrb[3].mxu1 }
 0x1f7   :  { %v478_v25 = vadd.f32 %v748_v22, %v702_v20 }
 0x1f9   :  { %v483_v26 = vmul.f32 0.1, %v478_v25 }
 0x1fb   :  { %v484_v27 = vmax.f32 %v478_v25, %v483_v26 }
 0x1fd   :  { %v485_v28 = vpack.c.bf16 %v484_v27, %v484_v27 }
 0x1ff   :  { %778 = vmatmul.mubr.bf16.vlgmr.msra.gmra.mrb[4].mxu1 %v485_v28 }
 0x2d2   :  { %v591_v33 = vpop.f32.mrb[4].mxu1 }
 0x2d3   :  { %v592_v34 = vadd.f32 %v719_v32, %v591_v33  ;;  %v779_v36 = vpop.f32.mrb[5].mxu1 }
 0x2d4   :  { %v594_v37 = vpop.f32.mrb[6].mxu1 }
 0x2d5   :  { %v597_v38 = vpack.c.bf16 %v592_v34, %v592_v34  ;;  %v780_v39 = vpop.f32.mrb[7].mxu1 }
 0x2d7   :  { %v605_v40 = vrot.slane %v597_v38, %v604_v35 }
 0x2d9   :  { %728 = vst.sshfl [vmem:[#allocation2] sm:$0x1 pattern:$0x73625140] %v605_v40 }
 0x2e0   :  { %v648_v41 = vld [vmem:[#allocation2] sm:$0x1] }
 0x2e1   :  { %649 = vst [vmem:[%s1102_s7] sm:$0x1] %v648_v41 }

</bundles_post_ra>
